<compile_context>
chip_gen: v5e
topology: v5e:2x2
jax: 0.10.0
libtpu: 0.0.40
codegen_flags: <defaults>
</compile_context>

<pallas_src>
import functools

import jax
import jax.numpy as jnp
from jax.experimental import pallas as pl
from jax.experimental.pallas import tpu as pltpu


def _round_up(x, m):
    return (x + m - 1) // m * m


def _cdiv(a, b):
    return -(-a // b)


def critic_kernel(s_ref, a_ref, ws_ref, wa_ref, w2_ref, vec_ref, out_ref):
    # s_ref:   (tb, sd)  f32   raw state tile
    # a_ref:   (tb, ad)  f32   raw action tile
    # ws_ref:  (sd, 256) bf16  fc1 weight, lanes 0..124 (rest 0)
    # wa_ref:  (ad, 256) bf16  fa1 weight, lanes 128..252 (rest 0)
    # w2_ref:  (256,256) bf16  fca1 weight, row-remapped; row 255 carries b2,
    #                          column 255 propagates the constant-1 lane
    # vec_ref: (2, 256)  f32   row 0: layer-1 bias (lane 255 = 1.0)
    #                          row 1: fca2 weight row (lane 255 = b3)
    # out_ref: (1, 1, tb) f32  lane-dense per-tile output
    h = jnp.dot(s_ref[...].astype(jnp.bfloat16), ws_ref[...],
                preferred_element_type=jnp.float32)
    h = h + jnp.dot(a_ref[...].astype(jnp.bfloat16), wa_ref[...],
                    preferred_element_type=jnp.float32)
    # Layer 1 bias + ReLU (lane 255 becomes the constant-1 channel).
    h = jnp.maximum(h + vec_ref[0:1, :], 0.0)

    # Layer 2: fca1 + ReLU.  b2 is folded in via the constant-1 lane.
    h = jnp.maximum(
        jnp.dot(h.astype(jnp.bfloat16), w2_ref[...],
                preferred_element_type=jnp.float32),
        0.0)

    # Layer 3 (250 -> 1) + b3 as a (1,256) x (tb,256)^T dot -> lane-dense (1, tb).
    v = jax.lax.dot_general(
        vec_ref[1:2, :].astype(jnp.bfloat16), h.astype(jnp.bfloat16),
        dimension_numbers=(((1,), (1,)), ((), ())),
        preferred_element_type=jnp.float32)
    out_ref[0] = v


def prepare_critic_params(params, state_dim, action_dim):
    """Pad / remap / bias-fold the raw (transposed-torch-layout) params once."""
    w1, b1, wa, ba, w2, b2, w3, b3 = params
    H, F = 128, 256

    # Per-branch layer-1 weights, lane-padded into disjoint halves of F=256.
    ws = jnp.zeros((state_dim, F), jnp.float32).at[:, :125].set(w1)
    wap = jnp.zeros((action_dim, F), jnp.float32).at[:, H:H + 125].set(wa)

    # Layer-1 bias; lane 255 is the constant-1 channel (relu(0 + 1) = 1).
    b_in = jnp.zeros((1, F), jnp.float32)
    b_in = b_in.at[:, :125].set(b1).at[:, H:H + 125].set(ba)
    b_in = b_in.at[:, 255].set(1.0)

    # fca1: rows 0..124 act on xs, rows 128..252 act on xa; cols padded 250->256.
    # Row 255 injects b2 (multiplied by the constant-1 lane) and keeps the
    # constant-1 lane alive in column 255 for the final layer.
    w2p = jnp.zeros((F, F), jnp.float32)
    w2p = w2p.at[:125, :250].set(w2[:125])
    w2p = w2p.at[H:H + 125, :250].set(w2[125:])
    w2p = w2p.at[255, :250].set(b2[0])
    w2p = w2p.at[255, 255].set(1.0)

    # fca2 as a single row; lane 255 carries b3 (dotted with the constant 1).
    w3row = jnp.zeros((1, F), jnp.float32).at[:, :250].set(w3[:, 0])
    w3row = w3row.at[:, 255].set(b3[0, 0])

    vec = jnp.concatenate([b_in, w3row], axis=0)          # (2, 256) f32
    return (ws.astype(jnp.bfloat16), wap.astype(jnp.bfloat16),
            w2p.astype(jnp.bfloat16), vec)


def critic_forward(state, action, prepared, *, block_b=2048):
    """state: (B, state_dim), action: (B, action_dim) -> (B, 1) float32."""
    ws, wap, w2p, vec = prepared
    F = w2p.shape[1]
    B, sd = state.shape
    ad = action.shape[1]

    # Batch tiling: multiples of 8 sublanes; big tiles to amortize the
    # ~0.35 us per-grid-step overhead; >=2 tiles once the batch is large
    # enough so both v7x TensorCores get work via the "parallel" axis.
    Bp8 = _round_up(B, 8)
    if Bp8 > block_b:
        n_tiles = max(2, _cdiv(Bp8, block_b))
    elif Bp8 >= 1024:
        n_tiles = 2
    else:
        n_tiles = 1
    tb = _round_up(_cdiv(Bp8, n_tiles), 8)
    Bp = _round_up(B, tb)
    n_tiles = Bp // tb

    # Only pad when the batch isn't already tile-aligned (trace-time check).
    if Bp != B:
        state = jnp.pad(state, ((0, Bp - B), (0, 0)))
        action = jnp.pad(action, ((0, Bp - B), (0, 0)))

    out = pl.pallas_call(
        critic_kernel,
        out_shape=jax.ShapeDtypeStruct((n_tiles, 1, tb), jnp.float32),
        grid_spec=pltpu.PrefetchScalarGridSpec(
            num_scalar_prefetch=0,
            grid=(n_tiles,),
            in_specs=[
                pl.BlockSpec((tb, sd), lambda i: (i, 0)),   # state: per-tile
                pl.BlockSpec((tb, ad), lambda i: (i, 0)),   # action: per-tile
                pl.BlockSpec((sd, F), lambda i: (0, 0)),    # weights: VMEM-resident
                pl.BlockSpec((ad, F), lambda i: (0, 0)),
                pl.BlockSpec((F, F), lambda i: (0, 0)),
                pl.BlockSpec((2, F), lambda i: (0, 0)),
            ],
            out_specs=pl.BlockSpec((1, 1, tb), lambda i: (i, 0, 0)),
        ),
        compiler_params=pltpu.CompilerParams(
            dimension_semantics=("parallel",)),
    )(state, action, ws, wap, w2p, vec)

    # (n_tiles, 1, tb) lane-dense -> (B, 1)
    return out.reshape(Bp, 1)[:B]


# ----------------------------- init / reference -----------------------------

def xavier_uniform(key, fan_in, fan_out):
    # matches nn.init.xavier_uniform_ on a (fan_out, fan_in) torch weight,
    # stored transposed as (fan_in, fan_out)
    bound = jnp.sqrt(6.0 / (fan_in + fan_out))
    return jax.random.uniform(key, (fan_in, fan_out), jnp.float32, -bound, bound)


def init_critic_params(key, state_dim, action_dim):
    k1, k2, k3, k4 = jax.random.split(key, 4)
    w1 = xavier_uniform(k1, state_dim, 125)
    b1 = jnp.full((1, 125), 0.01, jnp.float32)
    wa = xavier_uniform(k2, action_dim, 125)
    ba = jnp.full((1, 125), 0.01, jnp.float32)
    w2 = xavier_uniform(k3, 250, 250)
    b2 = jnp.full((1, 250), 0.01, jnp.float32)
    w3 = xavier_uniform(k4, 250, 1)
    b3 = jnp.full((1, 1), 0.01, jnp.float32)
    return (w1, b1, wa, ba, w2, b2, w3, b3)


def critic_reference(state, action, params):
    # Pure fp32 reference matching the PyTorch forward.
    w1, b1, wa, ba, w2, b2, w3, b3 = params
    xs = jnp.maximum(state @ w1 + b1, 0.0)
    xa = jnp.maximum(action @ wa + ba, 0.0)
    x = jnp.concatenate([xs, xa], axis=1)
    x = jnp.maximum(x @ w2 + b2, 0.0)
    return x @ w3 + b3


if __name__ == "__main__":
    key = jax.random.PRNGKey(0)
    k_params, k_state, k_action = jax.random.split(key, 3)

    batch, state_dim, action_dim = 2, 32, 8
    params = init_critic_params(k_params, state_dim, action_dim)
    prepared = prepare_critic_params(params, state_dim, action_dim)

    state = jax.random.normal(k_state, (batch, state_dim), jnp.float32)
    action = jax.random.normal(k_action, (batch, action_dim), jnp.float32)

    fwd = jax.jit(functools.partial(critic_forward, prepared=prepared))
    out = jax.block_until_ready(fwd(state, action))

    ref = critic_reference(state, action, params)
    assert out.shape == (batch, 1)
    # bf16 MXU inputs -> looser tolerance vs. the fp32 reference.
    assert jnp.allclose(out, ref, atol=5e-2, rtol=5e-2), (out, ref)

    print("KERNEL_OK")
</pallas_src>

<mosaic_0001>
module attributes {stable_mosaic.version = 11 : i64} {
  func.func @critic_kernel(%arg0: i32, %arg1: memref<8x32xf32, #tpu.memory_space<vmem>>, %arg2: memref<8x8xf32, #tpu.memory_space<vmem>>, %arg3: memref<32x256xbf16, #tpu.memory_space<vmem>>, %arg4: memref<8x256xbf16, #tpu.memory_space<vmem>>, %arg5: memref<256x256xbf16, #tpu.memory_space<vmem>>, %arg6: memref<2x256xf32, #tpu.memory_space<vmem>>, %arg7: memref<1x1x8xf32, #tpu.memory_space<vmem>>) attributes {dimension_semantics = [#tpu.dimension_semantics<parallel>], iteration_bounds = array<i64: 1>, scalar_prefetch = 0 : i64, scratch_operands = 0 : i64, tpu.core_type = #tpu.core_type<tc>, window_params = [{transform_indices = @transform_0, window_bounds = array<i64: 8, 32>}, {transform_indices = @transform_1, window_bounds = array<i64: 8, 8>}, {pipeline_mode = #tpu.pipeline_mode<synchronous>, transform_indices = @transform_2, window_bounds = array<i64: 32, 256>}, {pipeline_mode = #tpu.pipeline_mode<synchronous>, transform_indices = @transform_3, window_bounds = array<i64: 8, 256>}, {pipeline_mode = #tpu.pipeline_mode<synchronous>, transform_indices = @transform_4, window_bounds = array<i64: 256, 256>}, {pipeline_mode = #tpu.pipeline_mode<synchronous>, transform_indices = @transform_5, window_bounds = array<i64: 2, 256>}, {transform_indices = @transform_6, window_bounds = array<i64: 1, 1, 8>}]} {
    %c0 = arith.constant 0 : index
    %c0_0 = arith.constant 0 : index
    %0 = vector.load %arg1[%c0, %c0_0] : memref<8x32xf32, #tpu.memory_space<vmem>>, vector<8x32xf32>
    %1 = arith.truncf %0 : vector<8x32xf32> to vector<8x32xbf16>
    %c0_1 = arith.constant 0 : index
    %c0_2 = arith.constant 0 : index
    %2 = vector.load %arg3[%c0_1, %c0_2] : memref<32x256xbf16, #tpu.memory_space<vmem>>, vector<32x256xbf16>
    %cst = arith.constant dense<0.000000e+00> : vector<8x256xf32>
    %3 = tpu.matmul %1, %2, %cst {dimension_numbers = #tpu.dot_dimension_numbers<[1], [0], [0], [1], [0, 0, 1, 1], [], []>} : vector<8x32xbf16>, vector<32x256xbf16>, vector<8x256xf32> -> vector<8x256xf32>
    %c0_3 = arith.constant 0 : index
    %c0_4 = arith.constant 0 : index
    %4 = vector.load %arg2[%c0_3, %c0_4] : memref<8x8xf32, #tpu.memory_space<vmem>>, vector<8x8xf32>
    %5 = arith.truncf %4 : vector<8x8xf32> to vector<8x8xbf16>
    %c0_5 = arith.constant 0 : index
    %c0_6 = arith.constant 0 : index
    %6 = vector.load %arg4[%c0_5, %c0_6] : memref<8x256xbf16, #tpu.memory_space<vmem>>, vector<8x256xbf16>
    %cst_7 = arith.constant dense<0.000000e+00> : vector<8x256xf32>
    %7 = tpu.matmul %5, %6, %cst_7 {dimension_numbers = #tpu.dot_dimension_numbers<[1], [0], [0], [1], [0, 0, 1, 1], [], []>} : vector<8x8xbf16>, vector<8x256xbf16>, vector<8x256xf32> -> vector<8x256xf32>
    %8 = arith.addf %3, %7 : vector<8x256xf32>
    %c0_8 = arith.constant 0 : index
    %c0_9 = arith.constant 0 : index
    %9 = vector.load %arg6[%c0_8, %c0_9] : memref<2x256xf32, #tpu.memory_space<vmem>>, vector<1x256xf32>
    %10 = vector.broadcast %9 : vector<1x256xf32> to vector<8x256xf32>
    %11 = arith.addf %8, %10 : vector<8x256xf32>
    %cst_10 = arith.constant 0.000000e+00 : f32
    %12 = vector.broadcast %cst_10 : f32 to vector<8x256xf32>
    %13 = arith.maximumf %11, %12 : vector<8x256xf32>
    %14 = arith.truncf %13 : vector<8x256xf32> to vector<8x256xbf16>
    %c0_11 = arith.constant 0 : index
    %c0_12 = arith.constant 0 : index
    %15 = vector.load %arg5[%c0_11, %c0_12] : memref<256x256xbf16, #tpu.memory_space<vmem>>, vector<256x256xbf16>
    %cst_13 = arith.constant dense<0.000000e+00> : vector<8x256xf32>
    %16 = tpu.matmul %14, %15, %cst_13 {dimension_numbers = #tpu.dot_dimension_numbers<[1], [0], [0], [1], [0, 0, 1, 1], [], []>} : vector<8x256xbf16>, vector<256x256xbf16>, vector<8x256xf32> -> vector<8x256xf32>
    %cst_14 = arith.constant 0.000000e+00 : f32
    %17 = vector.broadcast %cst_14 : f32 to vector<8x256xf32>
    %18 = arith.maximumf %16, %17 : vector<8x256xf32>
    %c1 = arith.constant 1 : index
    %c0_15 = arith.constant 0 : index
    %19 = vector.load %arg6[%c1, %c0_15] : memref<2x256xf32, #tpu.memory_space<vmem>>, vector<1x256xf32>
    %20 = arith.truncf %19 : vector<1x256xf32> to vector<1x256xbf16>
    %21 = arith.truncf %18 : vector<8x256xf32> to vector<8x256xbf16>
    %cst_16 = arith.constant dense<0.000000e+00> : vector<1x8xf32>
    %22 = tpu.matmul %20, %21, %cst_16 {dimension_numbers = #tpu.dot_dimension_numbers<[1], [1], [0], [0], [0, 0, 1, 0], [], []>} : vector<1x256xbf16>, vector<8x256xbf16>, vector<1x8xf32> -> vector<1x8xf32>
    %c0_17 = arith.constant 0 : index
    %c0_18 = arith.constant 0 : index
    %c0_19 = arith.constant 0 : index
    %23 = vector.load %arg7[%c0_17, %c0_18, %c0_19] : memref<1x1x8xf32, #tpu.memory_space<vmem>>, vector<1x1x8xf32>
    %24 = vector.shape_cast %23 : vector<1x1x8xf32> to vector<1x8xf32>
    %25 = vector.shape_cast %22 : vector<1x8xf32> to vector<1x1x8xf32>
    tpu.vector_store %arg7[%c0_17, %c0_18, %c0_19], %25 {strides = array<i32>} : memref<1x1x8xf32, #tpu.memory_space<vmem>>, vector<1x1x8xf32>,
    return
  }
  func.func @transform_0(%arg0: i32) -> (i32, i32) {
    %c0_i32 = arith.constant 0 : i32
    %c0_i32_0 = arith.constant 0 : i32
    return %arg0, %c0_i32 : i32, i32
  }
  func.func @transform_1(%arg0: i32) -> (i32, i32) {
    %c0_i32 = arith.constant 0 : i32
    %c0_i32_0 = arith.constant 0 : i32
    return %arg0, %c0_i32 : i32, i32
  }
  func.func @transform_2(%arg0: i32) -> (i32, i32) {
    %c0_i32 = arith.constant 0 : i32
    %c0_i32_0 = arith.constant 0 : i32
    %c0_i32_1 = arith.constant 0 : i32
    return %c0_i32, %c0_i32_0 : i32, i32
  }
  func.func @transform_3(%arg0: i32) -> (i32, i32) {
    %c0_i32 = arith.constant 0 : i32
    %c0_i32_0 = arith.constant 0 : i32
    %c0_i32_1 = arith.constant 0 : i32
    return %c0_i32, %c0_i32_0 : i32, i32
  }
  func.func @transform_4(%arg0: i32) -> (i32, i32) {
    %c0_i32 = arith.constant 0 : i32
    %c0_i32_0 = arith.constant 0 : i32
    %c0_i32_1 = arith.constant 0 : i32
    return %c0_i32, %c0_i32_0 : i32, i32
  }
  func.func @transform_5(%arg0: i32) -> (i32, i32) {
    %c0_i32 = arith.constant 0 : i32
    %c0_i32_0 = arith.constant 0 : i32
    %c0_i32_1 = arith.constant 0 : i32
    return %c0_i32, %c0_i32_0 : i32, i32
  }
  func.func @transform_6(%arg0: i32) -> (i32, i32, i32) {
    %c0_i32 = arith.constant 0 : i32
    %c0_i32_0 = arith.constant 0 : i32
    %c0_i32_1 = arith.constant 0 : i32
    return %arg0, %c0_i32, %c0_i32_0 : i32, i32, i32
  }
}

</mosaic_0001>

<bundles_post_ra>
// kernel: critic_forward.1
= control target key start
LH: loop header
LB: loop body
LE: loop exit
PB: predicated region body
PF: predicated region fallthrough
CT: control target
= control target key end

     0   :  { %11 = vsyncpa [#allocation3], 0  ;;  %s770_s0 = inlined_call_operand.vmem [shape: f32[8,32], index: 0, kind: input, shape index: {}]   ;;  %s771_s1 = inlined_call_operand.vmem [shape: f32[8,8], index: 1, kind: input, shape index: {}]   ;;  %s772_s2 = inlined_call_operand.hbm [shape: bf16[32,256], index: 2, kind: input, shape index: {}]   ;;  %s773_s3 = inlined_call_operand.vmem [shape: bf16[8,256], index: 3, kind: input, shape index: {}]   ;;  %s774_s4 = inlined_call_operand.hbm [shape: bf16[256,256], index: 4, kind: input, shape index: {}]   ;;  %s775_s5 = inlined_call_operand.vmem [shape: f32[2,256], index: 5, kind: input, shape index: {}]   ;;  %s776_s6 = inlined_call_operand.vmem [shape: f32[1,1,8], index: 6, kind: output, shape index: {}]  }
   0x1   :  { %s21_s23 = sshll.u32 %s772_s2, 4  ;;  %s22_s23 = int_to_ptr.hbm [resolvable:$true] %s21_s23 }
   0x2   :  { %12 = vsyncpa [#allocation5], 0  ;;  %s701_s24 = smov [#allocation2]   ;;  %s36_s28 = sshll.u32 %s774_s4, 4  ;;  %s37_s28 = int_to_ptr.hbm [resolvable:$true] %s36_s28 }
   0x3   :  { %s23_s25 = sshll.u32 %s701_s24, 4  ;;  %s702_s29 = smov 128   ;;  %s24_s25 = int_to_ptr.vmem [resolvable:$true] %s23_s25 }
   0x4   :  { %s703_s30 = smov 8   ;;  %s704_s7 = smov [#allocation4]  }
   0x5   :  { %29 = dma.hbm_to_vmem [thread:$0]  %s22_s23, 512, %s24_s25, [#allocation3], %s702_s29, %s702_s29, %s703_s30  }
   0x6   :  { %s38_s8 = sshll.u32 %s704_s7, 4  ;;  %s39_s8 = int_to_ptr.vmem [resolvable:$true] %s38_s8 }
   0x7   :  { %44 = dma.hbm_to_vmem [thread:$0]  %s37_s28, 4096, %s39_s8, [#allocation5], %s702_s29, %s702_s29, %s703_s30  }
   0x8   :  { %697 = dma.done.wait [#allocation3], 512  }
   0x9   :  { %698 = vsyncadd [#allocation3], 4294966784 }
   0xa   :  { %699 = dma.done.wait [#allocation5], 4096  }
   0xb   :  { %700 = vsyncadd [#allocation5], 4294963200  ;;  %v472_v0 = vld [vmem:[#allocation2 + $0x10] sm:$0xf]  ;;  %v612_v1 = vld [vmem:[#allocation2 + $0x14] sm:$0xf0] }
   0xc   :  { %v611_v2 = vld [vmem:[#allocation2 + $0x14] sm:$0xf]  ;;  %v473_v3 = vor.u32 %v612_v1, %v472_v0  ;;  %v474_v4 = vld [vmem:[#allocation2 + $0x18] sm:$0xf0]  ;;  %v64_v5 = vld [vmem:[%s773_s3] sm:$0xff]  ;;  %vm74_vm0 = vcmask 1043456  }
   0xd   :  { %v464_v6 = vld [vmem:[#allocation2] sm:$0xf]  ;;  %v477_v7 = vor.u32 %v611_v2, %v474_v4  ;;  %v66_v8 = vunpack.c.l.b16 %v64_v5  ;;  %v67_v9 = vunpack.c.h.b16 %v64_v5  ;;  %v610_v10 = vld [vmem:[#allocation2 + $0x4] sm:$0xf0]  ;;  %v609_v11 = vld [vmem:[#allocation2 + $0x4] sm:$0xf] }
   0xe   :  { %v466_v12 = vld [vmem:[#allocation2 + $0x8] sm:$0xf0]  ;;  %137 = vmatpush.bf16.msra.mxu2 %v473_v3  ;;  %v62_v13 = vld [vmem:[%s771_s1] sm:$0xff]  ;;  %vm70_vm1 = vcmask 64512   ;;  %v538_v15 = vld [vmem:[#allocation4 + $0x70] sm:$0xf]  ;;  %v465_v18 = vor.u32 %v610_v10, %v464_v6 }
   0xf   :  { %v56_v14 = vld [vmem:[%s770_s0] sm:$0xff]  ;;  %150 = vmatpush.bf16.msra.mxu3 %v477_v7  ;;  %v68_v16 = vpack.c.b16 %v66_v8, %v66_v8  ;;  %v69_v17 = vpack.c.b16 %v67_v9, %v67_v9  ;;  %v469_v19 = vor.u32 %v609_v11, %v466_v12  ;;  %v628_v20 = vld [vmem:[#allocation4 + $0x74] sm:$0xf0]  ;;  %v602_v21 = vld [vmem:[#allocation4 + $0xf0] sm:$0xf]  ;;  %v63_v30 = vpack.c.bf16 %v62_v13, %v62_v13 }
  0x10   :  { %v644_v22 = vld [vmem:[#allocation4 + $0xf4] sm:$0xf0]  ;;  %v539_v23 = vor.u32 %v628_v20, %v538_v15  ;;  %v627_v25 = vld [vmem:[#allocation4 + $0x74] sm:$0xf]  ;;  %v540_v26 = vld [vmem:[#allocation4 + $0x78] sm:$0xf0]  ;;  %v57_v33 = vpack.c.bf16 %v56_v14, %v56_v14 }
  0x11   :  { %v603_v24 = vor.u32 %v644_v22, %v602_v21  ;;  %v643_v27 = vld [vmem:[#allocation4 + $0xf4] sm:$0xf]  ;;  %v76_v28 = vsel %vm74_vm0, %v68_v16, 0  ;;  %v79_v29 = vsel %vm74_vm0, %v69_v17, 0  ;;  %v604_v31 = vld [vmem:[#allocation4 + $0xf8] sm:$0xf0]  ;;  %v543_v37 = vor.u32 %v627_v25, %v540_v26 }
  0x12   :  { %v530_v32 = vld [vmem:[#allocation4 + $0x60] sm:$0xf]  ;;  %88 = vmatpush.bf16.msra.mxu0 %v76_v28  ;;  %101 = vmatpush.bf16.msra.mxu1 %v79_v29  ;;  %v626_v34 = vld [vmem:[#allocation4 + $0x64] sm:$0xf0]  ;;  %vm127_vm2 = vcmask 261120   ;;  %v607_v38 = vor.u32 %v643_v27, %v604_v31  ;;  %vm452_vm3 = vcmask 57344  }
  0x13   :  { %v594_v35 = vld [vmem:[#allocation4 + $0xe0] sm:$0xf]  ;;  %v642_v36 = vld [vmem:[#allocation4 + $0xe4] sm:$0xf0]  ;;  %138 = vmatpush.bf16.msra.mxu2 %v465_v18  ;;  %151 = vmatpush.bf16.msra.mxu3 %v469_v19  ;;  %v625_v39 = vld [vmem:[#allocation4 + $0x64] sm:$0xf]  ;;  %v531_v41 = vor.u32 %v626_v34, %v530_v32 }
  0x14   :  { %v532_v40 = vld [vmem:[#allocation4 + $0x68] sm:$0xf0]  ;;  %v595_v42 = vor.u32 %v642_v36, %v594_v35  ;;  %v641_v43 = vld [vmem:[#allocation4 + $0xe4] sm:$0xf]  ;;  %v522_v45 = vld [vmem:[#allocation4 + $0x50] sm:$0xf] }
  0x15   :  { %v596_v44 = vld [vmem:[#allocation4 + $0xe8] sm:$0xf0]  ;;  %460 = vmatmul.msk.bf16.vlgmr.msra.gmra.mxu0 %vm70_vm1, %v63_v30  ;;  %461 = vmatmul.msk.bf16.vlgmr.msra.gmra.mxu1 %vm70_vm1, %v63_v30  ;;  %v624_v46 = vld [vmem:[#allocation4 + $0x54] sm:$0xf0]  ;;  %v586_v47 = vld [vmem:[#allocation4 + $0xd0] sm:$0xf]  ;;  %v535_v49 = vor.u32 %v625_v39, %v532_v40 }
  0x16   :  { %361 = vmatpush.bf16.msrb.mxu0 %v539_v23  ;;  %374 = vmatpush.bf16.msrb.mxu1 %v603_v24  ;;  %v640_v48 = vld [vmem:[#allocation4 + $0xd4] sm:$0xf0]  ;;  %v599_v50 = vor.u32 %v641_v43, %v596_v44  ;;  %v623_v51 = vld [vmem:[#allocation4 + $0x54] sm:$0xf]  ;;  %v524_v52 = vld [vmem:[#allocation4 + $0x58] sm:$0xf0]  ;;  %v523_v53 = vor.u32 %v624_v46, %v522_v45 }
  0x17   :  { %478 = vmatmul.msk.bf16.vlgmr.msra.gmra.mxu2 %vm127_vm2, %v57_v33  ;;  %479 = vmatmul.msk.bf16.vlgmr.msra.gmra.mxu3 %vm127_vm2, %v57_v33  ;;  %v587_v54 = vor.u32 %v640_v48, %v586_v47  ;;  %v639_v55 = vld [vmem:[#allocation4 + $0xd4] sm:$0xf]  ;;  %v588_v56 = vld [vmem:[#allocation4 + $0xd8] sm:$0xf0]  ;;  %v514_v57 = vld [vmem:[#allocation4 + $0x40] sm:$0xf]  ;;  %v527_v61 = vor.u32 %v623_v51, %v524_v52 }
  0x18   :  { %387 = vmatpush.bf16.msrb.mxu2 %v543_v37  ;;  %400 = vmatpush.bf16.msrb.mxu3 %v607_v38  ;;  %v622_v58 = vld [vmem:[#allocation4 + $0x44] sm:$0xf0]  ;;  %v578_v59 = vld [vmem:[#allocation4 + $0xc0] sm:$0xf]  ;;  %v591_v62 = vor.u32 %v639_v55, %v588_v56  ;;  %v621_v63 = vld [vmem:[#allocation4 + $0x44] sm:$0xf] }
  0x19   :  { %v638_v60 = vld [vmem:[#allocation4 + $0xc4] sm:$0xf0]  ;;  %v515_v0 = vor.u32 %v622_v58, %v514_v57  ;;  %v516_v2 = vld [vmem:[#allocation4 + $0x48] sm:$0xf0]  ;;  %v637_v3 = vld [vmem:[#allocation4 + $0xc4] sm:$0xf] }
  0x1a   :  { %362 = vmatpush.bf16.msrb.mxu0 %v531_v41  ;;  %375 = vmatpush.bf16.msrb.mxu1 %v595_v42  ;;  %v579_v1 = vor.u32 %v638_v60, %v578_v59  ;;  %v580_v4 = vld [vmem:[#allocation4 + $0xc8] sm:$0xf0]  ;;  %v519_v5 = vor.u32 %v621_v63, %v516_v2  ;;  %v506_v7 = vld [vmem:[#allocation4 + $0x30] sm:$0xf]  ;;  %v620_v8 = vld [vmem:[#allocation4 + $0x34] sm:$0xf0] }
  0x1b   :  { %v583_v6 = vor.u32 %v637_v3, %v580_v4  ;;  %v570_v9 = vld [vmem:[#allocation4 + $0xb0] sm:$0xf]  ;;  %v507_v10 = vor.u32 %v620_v8, %v506_v7  ;;  %v636_v11 = vld [vmem:[#allocation4 + $0xb4] sm:$0xf0]  ;;  %v619_v12 = vld [vmem:[#allocation4 + $0x34] sm:$0xf] }
  0x1c   :  { %388 = vmatpush.bf16.msrb.mxu2 %v535_v49  ;;  %401 = vmatpush.bf16.msrb.mxu3 %v599_v50  ;;  %v508_v13 = vld [vmem:[#allocation4 + $0x38] sm:$0xf0]  ;;  %v571_v14 = vor.u32 %v636_v11, %v570_v9  ;;  %v635_v16 = vld [vmem:[#allocation4 + $0xb4] sm:$0xf]  ;;  %v498_v18 = vld [vmem:[#allocation4 + $0x20] sm:$0xf] }
  0x1d   :  { %v511_v15 = vor.u32 %v619_v12, %v508_v13  ;;  %v572_v17 = vld [vmem:[#allocation4 + $0xb8] sm:$0xf0]  ;;  %v618_v20 = vld [vmem:[#allocation4 + $0x24] sm:$0xf0]  ;;  %v562_v21 = vld [vmem:[#allocation4 + $0xa0] sm:$0xf] }
  0x1e   :  { %363 = vmatpush.bf16.msrb.mxu0 %v523_v53  ;;  %376 = vmatpush.bf16.msrb.mxu1 %v587_v54  ;;  %v575_v19 = vor.u32 %v635_v16, %v572_v17  ;;  %v634_v22 = vld [vmem:[#allocation4 + $0xa4] sm:$0xf0]  ;;  %v499_v23 = vor.u32 %v618_v20, %v498_v18  ;;  %v617_v25 = vld [vmem:[#allocation4 + $0x24] sm:$0xf]  ;;  %v500_v26 = vld [vmem:[#allocation4 + $0x28] sm:$0xf0] }
  0x1f   :  { %v563_v24 = vor.u32 %v634_v22, %v562_v21  ;;  %v633_v27 = vld [vmem:[#allocation4 + $0xa4] sm:$0xf]  ;;  %v503_v28 = vor.u32 %v617_v25, %v500_v26  ;;  %v564_v29 = vld [vmem:[#allocation4 + $0xa8] sm:$0xf0]  ;;  %v490_v31 = vld [vmem:[#allocation4 + $0x10] sm:$0xf] }
  0x20   :  { %389 = vmatpush.bf16.msrb.mxu2 %v527_v61  ;;  %402 = vmatpush.bf16.msrb.mxu3 %v591_v62  ;;  %v567_v30 = vor.u32 %v633_v27, %v564_v29  ;;  %v616_v32 = vld [vmem:[#allocation4 + $0x14] sm:$0xf0]  ;;  %v554_v33 = vld [vmem:[#allocation4 + $0x90] sm:$0xf]  ;;  %v615_v37 = vld [vmem:[#allocation4 + $0x14] sm:$0xf] }
  0x21   :  { %v491_v34 = vor.u32 %v616_v32, %v490_v31  ;;  %v632_v35 = vld [vmem:[#allocation4 + $0x94] sm:$0xf0]  ;;  %v492_v38 = vld [vmem:[#allocation4 + $0x18] sm:$0xf0]  ;;  %v631_v40 = vld [vmem:[#allocation4 + $0x94] sm:$0xf] }
  0x22   :  { %364 = vmatpush.bf16.msrb.mxu0 %v515_v0  ;;  %377 = vmatpush.bf16.msrb.mxu1 %v579_v1  ;;  %v555_v36 = vor.u32 %v632_v35, %v554_v33  ;;  %v495_v39 = vor.u32 %v615_v37, %v492_v38  ;;  %v556_v41 = vld [vmem:[#allocation4 + $0x98] sm:$0xf0]  ;;  %v482_v43 = vld [vmem:[#allocation4] sm:$0xf]  ;;  %v614_v44 = vld [vmem:[#allocation4 + $0x4] sm:$0xf0] }
  0x23   :  { %v559_v42 = vor.u32 %v631_v40, %v556_v41  ;;  %v546_v45 = vld [vmem:[#allocation4 + $0x80] sm:$0xf]  ;;  %v483_v46 = vor.u32 %v614_v44, %v482_v43  ;;  %v630_v47 = vld [vmem:[#allocation4 + $0x84] sm:$0xf0]  ;;  %v613_v48 = vld [vmem:[#allocation4 + $0x4] sm:$0xf] }
  0x24   :  { %390 = vmatpush.bf16.msrb.mxu2 %v519_v5  ;;  %403 = vmatpush.bf16.msrb.mxu3 %v583_v6  ;;  %v484_v49 = vld [vmem:[#allocation4 + $0x8] sm:$0xf0]  ;;  %v547_v50 = vor.u32 %v630_v47, %v546_v45  ;;  %v629_v52 = vld [vmem:[#allocation4 + $0x84] sm:$0xf] }
  0x25   :  { %v487_v51 = vor.u32 %v613_v48, %v484_v49  ;;  %v548_v53 = vld [vmem:[#allocation4 + $0x88] sm:$0xf0]  ;;  %v157_v57 = vld [vmem:[%s775_s5] ss:$2 sm:$0x3] }
  0x26   :  { %365 = vmatpush.bf16.msrb.mxu0 %v507_v10  ;;  %378 = vmatpush.bf16.msrb.mxu1 %v571_v14  ;;  %v551_v54 = vor.u32 %v629_v52, %v548_v53  ;;  %v159_v58 = vperm.slane %v157_v57, 0  ;;  %v160_v59 = vperm.slane %v157_v57, 1  ;;  %v608_v14 = vld [vmem:[%s775_s5 + $0x1] ss:$2 sm:$0x3] }
  0x27   :  { %v418_v16 = vperm.slane %v608_v14, 0  ;;  %v419_v25 = vperm.slane %v608_v14, 1 }
  0x28   :  { %391 = vmatpush.bf16.msrb.mxu2 %v511_v15  ;;  %404 = vmatpush.bf16.msrb.mxu3 %v575_v19 }
  0x2a   :  { %366 = vmatpush.bf16.msrb.mxu0 %v499_v23  ;;  %379 = vmatpush.bf16.msrb.mxu1 %v563_v24  ;;  %v422_v23 = vpack.c.bf16 %v418_v16, %v418_v16 }
  0x2c   :  { %392 = vmatpush.bf16.msrb.mxu2 %v503_v28  ;;  %405 = vmatpush.bf16.msrb.mxu3 %v567_v30  ;;  %v423_v28 = vpack.c.bf16 %v419_v25, %v419_v25 }
  0x2e   :  { %367 = vmatpush.bf16.msrb.mxu0 %v491_v34  ;;  %380 = vmatpush.bf16.msrb.mxu1 %v555_v36 }
  0x30   :  { %393 = vmatpush.bf16.msrb.mxu2 %v495_v39  ;;  %406 = vmatpush.bf16.msrb.mxu3 %v559_v42 }
  0x32   :  { %368 = vmatpush.bf16.msrb.mxu0 %v483_v46  ;;  %381 = vmatpush.bf16.msrb.mxu1 %v547_v50 }
  0x34   :  { %394 = vmatpush.bf16.msrb.mxu2 %v487_v51  ;;  %407 = vmatpush.bf16.msrb.mxu3 %v551_v54 }
  0x92   :  { %v90_v55 = vpop.f32.mrf.mxu0  ;;  %v103_v56 = vpop.f32.mrf.mxu1 }
  0x9a   :  { %v140_v60 = vpop.f32.mrf.mxu2  ;;  %v153_v61 = vpop.f32.mrf.mxu3 }
  0x9b   :  { %v141_v62 = vadd.f32 %v140_v60, %v90_v55  ;;  %v154_v63 = vadd.f32 %v153_v61, %v103_v56  ;;  %v92_v0 = vpop.f32.mrf.mxu0  ;;  %v105_v1 = vpop.f32.mrf.mxu1 }
  0x9d   :  { %v163_v2 = vadd.f32 %v159_v58, %v141_v62  ;;  %v164_v3 = vadd.f32 %v160_v59, %v154_v63 }
  0x9f   :  { %v165_v4 = vmax.f32 %v163_v2, 0.0  ;;  %v166_v5 = vmax.f32 %v164_v3, 0.0 }
  0xa1   :  { %v167_v6 = vpack.c.bf16 %v165_v4, %v165_v4  ;;  %v168_v7 = vpack.c.bf16 %v166_v5, %v166_v5 }
  0xa2   :  { %v142_v8 = vpop.f32.mrf.mxu2  ;;  %v155_v9 = vpop.f32.mrf.mxu3 }
  0xa3   :  { %369 = vmatmul.bf16.vlgmr.msrb.gmra.mxu0 %v167_v6  ;;  %382 = vmatmul.bf16.vlgmr.msrb.gmra.mxu1 %v168_v7 }
  0xa4   :  { %395 = vmatmul.bf16.vlgmr.msrb.gmra.mxu2 %v167_v6  ;;  %408 = vmatmul.bf16.vlgmr.msrb.gmra.mxu3 %v168_v7 }
 0x120   :  { %v370_v10 = vpop.f32.mrf.mxu0  ;;  %v383_v11 = vpop.f32.mrf.mxu1 }
 0x121   :  { %v384_v12 = vadd.f32 %v383_v11, %v370_v10 }
 0x123   :  { %v413_v13 = vmax.f32 %v384_v12, 0.0 }
 0x125   :  { %v424_v15 = vpack.c.bf16 %v413_v13, %v413_v13 }
 0x127   :  { %v396_v17 = vpop.f32.mrf.mxu2  ;;  %v409_v18 = vpop.f32.mrf.mxu3  ;;  %433 = vmatpush.bf16.xpose.msra.mxu0 %v424_v15 }
 0x128   :  { %v410_v19 = vadd.f32 %v409_v18, %v396_v17  ;;  %v372_v20 = vpop.f32.mrf.mxu0  ;;  %v385_v21 = vpop.f32.mrf.mxu1 }
 0x12a   :  { %v414_v22 = vmax.f32 %v410_v19, 0.0 }
 0x12c   :  { %v425_v24 = vpack.c.bf16 %v414_v22, %v414_v22 }
 0x12e   :  { %446 = vmatpush.bf16.xpose.msra.mxu1 %v425_v24  ;;  %434 = vmatmul.bf16.vlgmr.msra.gmra.mxu0 %v422_v23 }
 0x12f   :  { %v398_v26 = vpop.f32.mrf.mxu2  ;;  %v411_v27 = vpop.f32.mrf.mxu3 }
 0x135   :  { %447 = vmatmul.bf16.vlgmr.msra.gmra.mxu1 %v423_v28 }
 0x1ab   :  { %v435_v29 = vpop.f32.mrf.mxu0 }
 0x1b2   :  { %v448_v30 = vpop.f32.mrf.mxu1 }
 0x1b3   :  { %v449_v31 = vadd.f32 %v448_v30, %v435_v29  ;;  %v437_v32 = vpop.f32.mrf.mxu0 }
 0x1b5   :  { %453 = vst.msk [vmem:[%s776_s6] sm:$0x1] %vm452_vm3, %v449_v31 }
 0x1ba   :  { %v450_v33 = vpop.f32.mrf.mxu1 }
 0x1bb   :  { %458 = vsyncpa [#allocation3], 1 }
 0x1bc   :  { %459 = vsyncpa [#allocation5], 1 }

</bundles_post_ra>
